<compile_context>
chip_gen: v7x
topology: tpu7x:2x2x1
jax: 0.10.0
libtpu: 0.0.40
codegen_flags: <defaults>
</compile_context>

<pallas_src>
import jax
import jax.numpy as jnp
from jax.experimental import pallas as pl
from jax.experimental.pallas import tpu as pltpu


def cond_disc_kernel(x_ref, cond_ref, w1x_ref, table_ref, w2_ref, b2_ref, out_ref):
    """One (TILE_N, CHW) batch tile of the fused ConditionalDiscriminator forward.

    x_ref     : (TILE_N, CHW)      f32   flattened image block (cast to bf16 in-kernel)
    cond_ref  : (TILE_N, 1)        int32 class id per row
    w1x_ref   : (CHW, HID)         bf16  X-half of the first Linear of the core model
    table_ref : (N_CLASSES, HID)   f32   folded conditional path: (E@Wfc+bfc)@W1c + b1
    w2_ref    : (1, HID)           f32   second Linear weight (as a row)
    b2_ref    : (1, 1)             f32
    out_ref   : (TILE_N, 1)        f32
    """
    # Single well-shaped MXU GEMM; in-kernel f32->bf16 cast (no extra HBM pass),
    # f32 accumulation.
    x = x_ref[...].astype(jnp.bfloat16)
    h = jnp.dot(x, w1x_ref[...], preferred_element_type=jnp.float32)     # (T, HID)

    # cat((X, cond_emb), dim=1) @ W1 + b1 == X @ W1[:CHW] + (cond_emb @ W1[CHW:] + b1)
    # Second term is a per-class constant -> gather it from the pinned table with
    # exact unrolled selects (n_classes is small; VPU slot is idle).  Garbage cond
    # ids in the ragged last tile only affect output rows that get sliced off.
    tbl = table_ref[...]                                                 # (C, HID)
    cond = cond_ref[...]                                                 # (T, 1)
    bias = jnp.broadcast_to(tbl[0:1, :], h.shape)
    for c in range(1, tbl.shape[0]):
        bias = jnp.where(cond == c, tbl[c:c + 1, :], bias)
    h = h + bias

    # LeakyReLU(0.2)
    h = jnp.where(h > 0, h, 0.2 * h)

    # Linear(HID, 1) + Sigmoid: VPU multiply + cross-lane reduce.
    logits = jnp.sum(h * w2_ref[...], axis=-1, keepdims=True) + b2_ref[...]
    out_ref[...] = jax.nn.sigmoid(logits)


def conditional_discriminator_forward(x_nchw, cond_ids, params, *, tile_n=1024):
    """Fold the conditional path, tile the batch, launch the Pallas kernel."""
    n = x_nchw.shape[0]
    chw = x_nchw.shape[1] * x_nchw.shape[2] * x_nchw.shape[3]
    hid = params["w1_x"].shape[1]

    # ---- Fold Embedding -> Linear -> cat -> (conditional half of first Linear) + b1
    # into a tiny per-class bias table.  Mathematically exact. ----
    table = (
        (params["emb_table"] @ params["w_fc"] + params["b_fc"]) @ params["w1_c"]
        + params["b1"]
    ).astype(jnp.float32)                                   # (n_classes, HID)

    # ---- Adaptive batch tile: large enough to amortize per-step overhead, small
    # enough that tiny batches don't over-pad and mid-size batches still yield
    # multiple tiles for 2-TensorCore (v7x) sharding. Multiple of 8 (f32 sublane). ----
    def _round_up(v, m):
        return ((v + m - 1) // m) * m

    tile_n = max(8, min(tile_n, _round_up(pl.cdiv(n, 4), 8)))
    num_tiles = pl.cdiv(n, tile_n)
    n_out = num_tiles * tile_n

    # ---- No pad / no cast materialization of X: one f32 HBM read via pipelined DMA.
    # The ragged last tile reads undefined rows past N; their outputs are sliced off.
    x_flat = x_nchw.reshape(n, chw)                          # view, no copy
    cond_col = cond_ids.reshape(n, 1).astype(jnp.int32)      # tiny
    w1x = params["w1_x"].astype(jnp.bfloat16)                # small weight, one-time
    w2_row = params["w2"].T.astype(jnp.float32)              # (1, HID)
    b2 = params["b2"].reshape(1, 1).astype(jnp.float32)

    out = pl.pallas_call(
        cond_disc_kernel,
        out_shape=jax.ShapeDtypeStruct((n_out, 1), jnp.float32),
        grid=(num_tiles,),
        in_specs=[
            pl.BlockSpec((tile_n, chw), lambda i: (i, 0)),   # X tile, double-buffered
            pl.BlockSpec((tile_n, 1), lambda i: (i, 0)),     # cond ids tile
            pl.BlockSpec((chw, hid), lambda i: (0, 0)),      # pinned W1 (X half), bf16
            pl.BlockSpec(table.shape, lambda i: (0, 0)),     # pinned per-class bias table
            pl.BlockSpec((1, hid), lambda i: (0, 0)),        # pinned w2 row
            pl.BlockSpec((1, 1), lambda i: (0, 0)),          # pinned b2
        ],
        out_specs=pl.BlockSpec((tile_n, 1), lambda i: (i, 0)),
        compiler_params=pltpu.CompilerParams(
            dimension_semantics=("parallel",),   # shard batch tiles over TCs (v7x)
            vmem_limit_bytes=32 * 1024 * 1024,   # >= v5e's 16 MiB default, <= v7x scoped
        ),
    )(x_flat, cond_col, w1x, table, w2_row, b2)

    return out[:n]


def reference_forward(x_nchw, cond_ids, params):
    """Pure-JAX f32 reference mirroring the PyTorch forward (no folding, no bf16)."""
    n = x_nchw.shape[0]
    emb = params["emb_table"][cond_ids]                                  # Embedding
    cond_emb = emb @ params["w_fc"] + params["b_fc"]                     # Linear
    x_cat = jnp.concatenate([x_nchw.reshape(n, -1), cond_emb], axis=1)   # view + cat(dim=1)
    w1 = jnp.concatenate([params["w1_x"], params["w1_c"]], axis=0)
    h = x_cat @ w1 + params["b1"]
    h = jnp.where(h > 0, h, 0.2 * h)
    return jax.nn.sigmoid(h @ params["w2"] + params["b2"])


def reference_forward_bf16(x_nchw, cond_ids, params):
    """Same math as the kernel (folded path + bf16 GEMM inputs), in plain JAX."""
    n = x_nchw.shape[0]
    table = (params["emb_table"] @ params["w_fc"] + params["b_fc"]) @ params["w1_c"] \
        + params["b1"]
    bias = table[cond_ids]
    h = jnp.dot(x_nchw.reshape(n, -1).astype(jnp.bfloat16),
                params["w1_x"].astype(jnp.bfloat16),
                preferred_element_type=jnp.float32) + bias
    h = jnp.where(h > 0, h, 0.2 * h)
    logits = jnp.sum(h * params["w2"].T, axis=-1, keepdims=True) + params["b2"]
    return jax.nn.sigmoid(logits)


if __name__ == "__main__":
    # Small shapes consistent with the module.
    N, C, H, W = 2, 4, 16, 16          # images: (N, C, H, W)
    N_CLASSES = 4                      # len(torch.unique(cond))
    COND_HIDDEN = 100                  # cond_embedding_n_units_hidden (module default)
    MODEL_HIDDEN = 32                  # hidden width of the core discriminator head
    CHW = C * H * W

    key = jax.random.PRNGKey(0)
    ks = jax.random.split(key, 9)

    x = jax.random.normal(ks[0], (N, C, H, W), dtype=jnp.float32)
    cond = jax.random.randint(ks[1], (N,), 0, N_CLASSES, dtype=jnp.int32)

    params = {
        # label_conditioned_generator = Embedding(n_classes, hidden) -> Linear(hidden, C*H*W)
        "emb_table": jax.random.normal(ks[2], (N_CLASSES, COND_HIDDEN), jnp.float32) * 0.1,
        "w_fc":      jax.random.normal(ks[3], (COND_HIDDEN, CHW), jnp.float32) * 0.05,
        "b_fc":      jax.random.normal(ks[4], (1, CHW), jnp.float32) * 0.05,
        # core model: Linear(2*CHW, HID) split into X-half and cond_emb-half
        "w1_x":      jax.random.normal(ks[5], (CHW, MODEL_HIDDEN), jnp.float32) * 0.02,
        "w1_c":      jax.random.normal(ks[6], (CHW, MODEL_HIDDEN), jnp.float32) * 0.02,
        "b1":        jnp.zeros((1, MODEL_HIDDEN), jnp.float32),
        "w2":        jax.random.normal(ks[7], (MODEL_HIDDEN, 1), jnp.float32) * 0.1,
        "b2":        jnp.zeros((1, 1), jnp.float32),
    }

    out = jax.block_until_ready(conditional_discriminator_forward(x, cond, params))
    assert out.shape == (N, 1)

    # Tight check vs a reference doing identical math (folded path, bf16 GEMM inputs).
    ref_bf16 = jax.block_until_ready(reference_forward_bf16(x, cond, params))
    assert jnp.allclose(out, ref_bf16, atol=1e-4, rtol=1e-4)

    # Looser check vs the exact f32 PyTorch-mirror reference (bf16 quantization of X/W1).
    ref_f32 = jax.block_until_ready(reference_forward(x, cond, params))
    assert jnp.allclose(out, ref_f32, atol=2e-2, rtol=2e-2)

    # TODO(synk): the original `self.model` is an arbitrary injected nn.Module
    # (e.g. a ConvNet); here it is fixed to a deterministic MLP discriminator head.
    # TODO(synk): the cond=None branch (torch.randperm sampling of self.cond) is not
    # implemented; this wrapper always takes an explicit cond vector.
    print("KERNEL_OK")
</pallas_src>

<mosaic_0001>
module attributes {stable_mosaic.version = 11 : i64} {
  func.func @cond_disc_kernel(%arg0: i32, %arg1: memref<8x1024xf32, #tpu.memory_space<vmem>>, %arg2: memref<8x1xi32, #tpu.memory_space<vmem>>, %arg3: memref<1024x32xbf16, #tpu.memory_space<vmem>>, %arg4: memref<4x32xf32, #tpu.memory_space<vmem>>, %arg5: memref<1x32xf32, #tpu.memory_space<vmem>>, %arg6: memref<1x1xf32, #tpu.memory_space<vmem>>, %arg7: memref<8x1xf32, #tpu.memory_space<vmem>>) attributes {dimension_semantics = [#tpu.dimension_semantics<parallel>], iteration_bounds = array<i64: 1>, scalar_prefetch = 0 : i64, scratch_operands = 0 : i64, tpu.core_type = #tpu.core_type<tc>, window_params = [{transform_indices = @transform_0, window_bounds = array<i64: 8, 1024>}, {transform_indices = @transform_1, window_bounds = array<i64: 8, 1>}, {pipeline_mode = #tpu.pipeline_mode<synchronous>, transform_indices = @transform_2, window_bounds = array<i64: 1024, 32>}, {pipeline_mode = #tpu.pipeline_mode<synchronous>, transform_indices = @transform_3, window_bounds = array<i64: 4, 32>}, {pipeline_mode = #tpu.pipeline_mode<synchronous>, transform_indices = @transform_4, window_bounds = array<i64: 1, 32>}, {pipeline_mode = #tpu.pipeline_mode<synchronous>, transform_indices = @transform_5, window_bounds = array<i64: 1, 1>}, {transform_indices = @transform_6, window_bounds = array<i64: 8, 1>}]} {
    %c0 = arith.constant 0 : index
    %c0_0 = arith.constant 0 : index
    %0 = vector.load %arg1[%c0, %c0_0] : memref<8x1024xf32, #tpu.memory_space<vmem>>, vector<8x1024xf32>
    %1 = arith.truncf %0 : vector<8x1024xf32> to vector<8x1024xbf16>
    %c0_1 = arith.constant 0 : index
    %c0_2 = arith.constant 0 : index
    %2 = vector.load %arg3[%c0_1, %c0_2] : memref<1024x32xbf16, #tpu.memory_space<vmem>>, vector<1024x32xbf16>
    %cst = arith.constant dense<0.000000e+00> : vector<8x32xf32>
    %3 = tpu.matmul %1, %2, %cst {dimension_numbers = #tpu.dot_dimension_numbers<[1], [0], [0], [1], [0, 0, 1, 1], [], []>} : vector<8x1024xbf16>, vector<1024x32xbf16>, vector<8x32xf32> -> vector<8x32xf32>
    %c0_3 = arith.constant 0 : index
    %c0_4 = arith.constant 0 : index
    %4 = vector.load %arg4[%c0_3, %c0_4] : memref<4x32xf32, #tpu.memory_space<vmem>>, vector<4x32xf32>
    %c0_5 = arith.constant 0 : index
    %c0_6 = arith.constant 0 : index
    %5 = vector.load %arg2[%c0_5, %c0_6] : memref<8x1xi32, #tpu.memory_space<vmem>>, vector<8x1xi32>
    %6 = vector.extract_strided_slice %4 {offsets = [0, 0], sizes = [1, 32], strides = [1, 1]} : vector<4x32xf32> to vector<1x32xf32>
    %7 = vector.shape_cast %6 : vector<1x32xf32> to vector<1x32xf32>
    %8 = vector.broadcast %7 : vector<1x32xf32> to vector<8x32xf32>
    %c1_i32 = arith.constant 1 : i32
    %9 = vector.broadcast %c1_i32 : i32 to vector<8x1xi32>
    %10 = arith.cmpi eq, %5, %9 : vector<8x1xi32>
    %11 = vector.extract_strided_slice %4 {offsets = [1, 0], sizes = [1, 32], strides = [1, 1]} : vector<4x32xf32> to vector<1x32xf32>
    %12 = vector.shape_cast %10 : vector<8x1xi1> to vector<8x1xi1>
    %13 = vector.broadcast %12 : vector<8x1xi1> to vector<8x32xi1>
    %14 = vector.shape_cast %11 : vector<1x32xf32> to vector<1x32xf32>
    %15 = vector.broadcast %14 : vector<1x32xf32> to vector<8x32xf32>
    %16 = arith.select %13, %15, %8 : vector<8x32xi1>, vector<8x32xf32>
    %c2_i32 = arith.constant 2 : i32
    %17 = vector.broadcast %c2_i32 : i32 to vector<8x1xi32>
    %18 = arith.cmpi eq, %5, %17 : vector<8x1xi32>
    %19 = vector.extract_strided_slice %4 {offsets = [2, 0], sizes = [1, 32], strides = [1, 1]} : vector<4x32xf32> to vector<1x32xf32>
    %20 = vector.shape_cast %18 : vector<8x1xi1> to vector<8x1xi1>
    %21 = vector.broadcast %20 : vector<8x1xi1> to vector<8x32xi1>
    %22 = vector.shape_cast %19 : vector<1x32xf32> to vector<1x32xf32>
    %23 = vector.broadcast %22 : vector<1x32xf32> to vector<8x32xf32>
    %24 = arith.select %21, %23, %16 : vector<8x32xi1>, vector<8x32xf32>
    %c3_i32 = arith.constant 3 : i32
    %25 = vector.broadcast %c3_i32 : i32 to vector<8x1xi32>
    %26 = arith.cmpi eq, %5, %25 : vector<8x1xi32>
    %27 = vector.extract_strided_slice %4 {offsets = [3, 0], sizes = [1, 32], strides = [1, 1]} : vector<4x32xf32> to vector<1x32xf32>
    %28 = vector.shape_cast %26 : vector<8x1xi1> to vector<8x1xi1>
    %29 = vector.broadcast %28 : vector<8x1xi1> to vector<8x32xi1>
    %30 = vector.shape_cast %27 : vector<1x32xf32> to vector<1x32xf32>
    %31 = vector.broadcast %30 : vector<1x32xf32> to vector<8x32xf32>
    %32 = arith.select %29, %31, %24 : vector<8x32xi1>, vector<8x32xf32>
    %33 = arith.addf %3, %32 : vector<8x32xf32>
    %cst_7 = arith.constant 0.000000e+00 : f32
    %34 = vector.broadcast %cst_7 : f32 to vector<8x32xf32>
    %35 = arith.cmpf ogt, %33, %34 : vector<8x32xf32>
    %cst_8 = arith.constant 2.000000e-01 : f32
    %36 = vector.broadcast %cst_8 : f32 to vector<8x32xf32>
    %37 = arith.mulf %36, %33 : vector<8x32xf32>
    %38 = arith.select %35, %33, %37 : vector<8x32xi1>, vector<8x32xf32>
    %c0_9 = arith.constant 0 : index
    %c0_10 = arith.constant 0 : index
    %39 = vector.load %arg5[%c0_9, %c0_10] : memref<1x32xf32, #tpu.memory_space<vmem>>, vector<1x32xf32>
    %40 = vector.broadcast %39 : vector<1x32xf32> to vector<8x32xf32>
    %41 = arith.mulf %38, %40 : vector<8x32xf32>
    %cst_11 = arith.constant dense<0.000000e+00> : vector<8xf32>
    %42 = vector.multi_reduction <add>, %41, %cst_11 [1] : vector<8x32xf32> to vector<8xf32>
    %43 = vector.shape_cast %42 : vector<8xf32> to vector<8x1xf32>
    %c0_12 = arith.constant 0 : index
    %c0_13 = arith.constant 0 : index
    %44 = vector.load %arg6[%c0_12, %c0_13] : memref<1x1xf32, #tpu.memory_space<vmem>>, vector<1x1xf32>
    %45 = vector.broadcast %44 : vector<1x1xf32> to vector<8x1xf32>
    %46 = arith.addf %43, %45 : vector<8x1xf32>
    %47 = arith.negf %46 : vector<8x1xf32>
    %48 = math.exp %47 : vector<8x1xf32>
    %cst_14 = arith.constant 1.000000e+00 : f32
    %49 = vector.broadcast %cst_14 : f32 to vector<8x1xf32>
    %50 = arith.addf %49, %48 : vector<8x1xf32>
    %51 = arith.divf %49, %50 : vector<8x1xf32>
    %c0_15 = arith.constant 0 : index
    %c0_16 = arith.constant 0 : index
    %52 = vector.load %arg7[%c0_15, %c0_16] : memref<8x1xf32, #tpu.memory_space<vmem>>, vector<8x1xf32>
    tpu.vector_store %arg7[%c0_15, %c0_16], %51 {strides = array<i32>} : memref<8x1xf32, #tpu.memory_space<vmem>>, vector<8x1xf32>,
    return
  }
  func.func @transform_0(%arg0: i32) -> (i32, i32) {
    %c0_i32 = arith.constant 0 : i32
    %c0_i32_0 = arith.constant 0 : i32
    return %arg0, %c0_i32 : i32, i32
  }
  func.func @transform_1(%arg0: i32) -> (i32, i32) {
    %c0_i32 = arith.constant 0 : i32
    %c0_i32_0 = arith.constant 0 : i32
    return %arg0, %c0_i32 : i32, i32
  }
  func.func @transform_2(%arg0: i32) -> (i32, i32) {
    %c0_i32 = arith.constant 0 : i32
    %c0_i32_0 = arith.constant 0 : i32
    %c0_i32_1 = arith.constant 0 : i32
    return %c0_i32, %c0_i32_0 : i32, i32
  }
  func.func @transform_3(%arg0: i32) -> (i32, i32) {
    %c0_i32 = arith.constant 0 : i32
    %c0_i32_0 = arith.constant 0 : i32
    %c0_i32_1 = arith.constant 0 : i32
    return %c0_i32, %c0_i32_0 : i32, i32
  }
  func.func @transform_4(%arg0: i32) -> (i32, i32) {
    %c0_i32 = arith.constant 0 : i32
    %c0_i32_0 = arith.constant 0 : i32
    %c0_i32_1 = arith.constant 0 : i32
    return %c0_i32, %c0_i32_0 : i32, i32
  }
  func.func @transform_5(%arg0: i32) -> (i32, i32) {
    %c0_i32 = arith.constant 0 : i32
    %c0_i32_0 = arith.constant 0 : i32
    %c0_i32_1 = arith.constant 0 : i32
    return %c0_i32, %c0_i32_0 : i32, i32
  }
  func.func @transform_6(%arg0: i32) -> (i32, i32) {
    %c0_i32 = arith.constant 0 : i32
    %c0_i32_0 = arith.constant 0 : i32
    return %arg0, %c0_i32 : i32, i32
  }
}

</mosaic_0001>

<bundles_post_ra>
// kernel: tpu_custom_call.1
= control target key start
LH: loop header
LB: loop body
LE: loop exit
PB: predicated region body
PF: predicated region fallthrough
CT: control target
= control target key end

     0   :  { %v1115_v1 = vmov 0   ;;  %v1116_v25 = vmov 1983009808   ;;  %v49_v27 = vlaneseq  ;;  %vm852_vm7 = vcmask 261120   ;;  %s1405_s2 = inlined_call_operand.vmem [shape: bf16[1024,32], index: 2, kind: input, shape index: {}]   ;;  %s1406_s0 = inlined_call_operand.vmem [shape: f32[2,1024], index: 0, kind: input, shape index: {}]   ;;  %s1407_s1 = inlined_call_operand.vmem [shape: s32[2,1], index: 1, kind: input, shape index: {}]   ;;  %s1408_s5 = inlined_call_operand.<no memory space> [shape: f32[1,1], index: 5, kind: input, shape index: {}]   ;;  %s1409_s3 = inlined_call_operand.vmem [shape: f32[4,32], index: 3, kind: input, shape index: {}]   ;;  %s1410_s4 = inlined_call_operand.vmem [shape: f32[1,32], index: 4, kind: input, shape index: {}]   ;;  %s1411_s6 = inlined_call_operand.vmem [shape: f32[8,1], index: 6, kind: output, shape index: {}]  }
   0x1   :  { %v1035_v0 = vld [vmem:[%s1405_s2 + $0x40] sm:$0xff]   ;;  %1033 = vset.pattern.permute.xlu0 %v1115_v1  ;;  %1034 = vset.pattern.permute.xlu1 %v1115_v1  ;;  %v1039_v5 = vld [vmem:[%s1405_s2 + $0x48] sm:$0xff]   ;;  %v1043_v9 = vld [vmem:[%s1405_s2 + $0x50] sm:$0xff]   ;;  %v47_v26 = vunpack.c.l.s4 %v1116_v25  ;;  %vm870_vm8 = vcmask 7168  }
   0x2   :  { %v1036_v2 = vld [vmem:[%s1405_s2 + $0xc0] sm:$0xff]   ;;  %943 = vmatprep.subr.bf16.mxu0 %v1035_v0  ;;  %v1040_v6 = vld [vmem:[%s1405_s2 + $0xc8] sm:$0xff]   ;;  %v1044_v10 = vld [vmem:[%s1405_s2 + $0xd0] sm:$0xff]   ;;  %v1238_v33 = vshrl.u32 %v49_v27, 7 }
   0x3   :  { %v1037_v3 = vld [vmem:[%s1405_s2] sm:$0xff]   ;;  %965 = vmatprep.subr.bf16.mxu1 %v1036_v2  ;;  %v1041_v7 = vld [vmem:[%s1405_s2 + $0x8] sm:$0xff]   ;;  %v1045_v11 = vld [vmem:[%s1405_s2 + $0x10] sm:$0xff]   ;;  %v48_v32 = vunpack.c.0.s8 %v47_v26 }
   0x4   :  { %v1038_v4 = vld [vmem:[%s1405_s2 + $0x80] sm:$0xff]   ;;  %944 = vmatpush3.bf16.msra.mxu0 %v1037_v3  ;;  %v1042_v8 = vld [vmem:[%s1405_s2 + $0x88] sm:$0xff]   ;;  %v1046_v12 = vld [vmem:[%s1405_s2 + $0x90] sm:$0xff]  }
   0x5   :  { %966 = vmatpush3.bf16.msra.mxu1 %v1038_v4  ;;  %945 = vmatprep.subr.bf16.mxu0 %v1039_v5  ;;  %v1047_v13 = vld [vmem:[%s1405_s2 + $0x58] sm:$0xff]   ;;  %v1051_v17 = vld [vmem:[%s1405_s2 + $0x60] sm:$0xff]   ;;  %v1055_v21 = vld [vmem:[%s1405_s2 + $0x68] sm:$0xff]   ;;  %v1253_v38 = vsub.s32 %v48_v32, %v1238_v33 }
   0x6   :  { %967 = vmatprep.subr.bf16.mxu1 %v1040_v6  ;;  %v1048_v14 = vld [vmem:[%s1405_s2 + $0xd8] sm:$0xff]   ;;  %v1052_v18 = vld [vmem:[%s1405_s2 + $0xe0] sm:$0xff]   ;;  %v1056_v22 = vld [vmem:[%s1405_s2 + $0xe8] sm:$0xff]  }
   0x7   :  { %v1049_v15 = vld [vmem:[%s1405_s2 + $0x18] sm:$0xff]   ;;  %v1053_v19 = vld [vmem:[%s1405_s2 + $0x20] sm:$0xff]   ;;  %v1057_v23 = vld [vmem:[%s1405_s2 + $0x28] sm:$0xff]  }
   0x8   :  { %946 = vmatpush3.bf16.msra.mxu0 %v1041_v7  ;;  %v1050_v16 = vld [vmem:[%s1405_s2 + $0x98] sm:$0xff]   ;;  %v1054_v20 = vld [vmem:[%s1405_s2 + $0xa0] sm:$0xff]   ;;  %v1058_v24 = vld [vmem:[%s1405_s2 + $0xa8] sm:$0xff]  }
   0x9   :  { %968 = vmatpush3.bf16.msra.mxu1 %v1042_v8  ;;  %947 = vmatprep.subr.bf16.mxu0 %v1043_v9  ;;  %v1059_v28 = vld [vmem:[%s1405_s2 + $0x70] sm:$0xff]   ;;  %v1063_v34 = vld [vmem:[%s1405_s2 + $0x78] sm:$0xff]   ;;  %v1073_v45 = vld [vmem:[%s1405_s2 + $0x140] sm:$0xff]  }
   0xa   :  { %969 = vmatprep.subr.bf16.mxu1 %v1044_v10  ;;  %v1060_v29 = vld [vmem:[%s1405_s2 + $0xf0] sm:$0xff]   ;;  %v1064_v35 = vld [vmem:[%s1405_s2 + $0xf8] sm:$0xff]   ;;  %v1074_v48 = vld [vmem:[%s1405_s2 + $0x1c0] sm:$0xff]  }
   0xb   :  { %v1061_v30 = vld [vmem:[%s1405_s2 + $0x30] sm:$0xff]   ;;  %v1065_v36 = vld [vmem:[%s1405_s2 + $0x38] sm:$0xff]   ;;  %v1075_v51 = vld [vmem:[%s1405_s2 + $0x100] sm:$0xff]  }
   0xc   :  { %948 = vmatpush3.bf16.msra.mxu0 %v1045_v11  ;;  %v1062_v31 = vld [vmem:[%s1405_s2 + $0xb0] sm:$0xff]   ;;  %v1066_v37 = vld [vmem:[%s1405_s2 + $0xb8] sm:$0xff]   ;;  %v1076_v54 = vld [vmem:[%s1405_s2 + $0x180] sm:$0xff]  }
   0xd   :  { %970 = vmatpush3.bf16.msra.mxu1 %v1046_v12  ;;  %949 = vmatprep.subr.bf16.mxu0 %v1047_v13  ;;  %v1067_v39 = vld [vmem:[%s1406_s0] ss:$16 sps:$4 sm:$0xff]   ;;  %v1071_v41 = vld [vmem:[%s1406_s0 + $0x4] ss:$16 sps:$4 sm:$0xff]   ;;  %v1077_v57 = vld [vmem:[%s1405_s2 + $0x148] sm:$0xff]  }
   0xe   :  { %971 = vmatprep.subr.bf16.mxu1 %v1048_v14  ;;  %v1069_v40 = vld [vmem:[%s1406_s0 + $0x20] ss:$16 sps:$4 sm:$0xff]   ;;  %v1072_v42 = vld [vmem:[%s1406_s0 + $0x24] ss:$16 sps:$4 sm:$0xff]   ;;  %v52_v43 = vrot.slane %v1067_v39, %v1253_v38  ;;  %v59_v46 = vrot.slane %v1071_v41, %v1253_v38  ;;  %v1078_v60 = vld [vmem:[%s1405_s2 + $0x1c8] sm:$0xff]  }
   0xf   :  { %v66_v44 = vrot.slane %v1069_v40, %v1253_v38  ;;  %v73_v47 = vrot.slane %v1072_v42, %v1253_v38  ;;  %v1079_v61 = vld [vmem:[%s1405_s2 + $0x108] sm:$0xff]   ;;  %v1081_v63 = vld [vmem:[%s1405_s2 + $0x150] sm:$0xff]   ;;  %v1085_v4 = vld [vmem:[%s1405_s2 + $0x158] sm:$0xff]  }
  0x10   :  { %950 = vmatpush3.bf16.msra.mxu0 %v1049_v15  ;;  %v1080_v62 = vld [vmem:[%s1405_s2 + $0x188] sm:$0xff]   ;;  %v1082_v0 = vld [vmem:[%s1405_s2 + $0x1d0] sm:$0xff]   ;;  %v1086_v5 = vld [vmem:[%s1405_s2 + $0x1d8] sm:$0xff]  }
  0x11   :  { %972 = vmatpush3.bf16.msra.mxu1 %v1050_v16  ;;  %951 = vmatprep.subr.bf16.mxu0 %v1051_v17  ;;  %v75_v49 = vcombine.high %v52_v43, %v66_v44  ;;  %v74_v50 = vcombine.low %v52_v43, %v66_v44  ;;  %v77_v52 = vcombine.high %v59_v46, %v73_v47  ;;  %v1083_v2 = vld [vmem:[%s1405_s2 + $0x110] sm:$0xff]   ;;  %v1087_v6 = vld [vmem:[%s1405_s2 + $0x118] sm:$0xff]   ;;  %v1089_v8 = vld [vmem:[%s1405_s2 + $0x160] sm:$0xff]  }
  0x12   :  { %973 = vmatprep.subr.bf16.mxu1 %v1052_v18  ;;  %v76_v53 = vcombine.low %v59_v46, %v73_v47  ;;  %v1084_v3 = vld [vmem:[%s1405_s2 + $0x190] sm:$0xff]   ;;  %v1088_v7 = vld [vmem:[%s1405_s2 + $0x198] sm:$0xff]   ;;  %v1090_v9 = vld [vmem:[%s1405_s2 + $0x1e0] sm:$0xff]   ;;  %v262_v47 = vsub.s32 0, %v1238_v33 }
  0x13   :  { %v123_v55 = vpack.c.bf16 %v75_v49, %v75_v49  ;;  %v122_v56 = vpack.c.bf16 %v74_v50, %v74_v50  ;;  %v125_v58 = vpack.c.bf16 %v77_v52, %v77_v52  ;;  %v1091_v10 = vld [vmem:[%s1405_s2 + $0x120] sm:$0xff]   ;;  %v1093_v12 = vld [vmem:[%s1405_s2 + $0x168] sm:$0xff]   ;;  %v1097_v16 = vld [vmem:[%s1405_s2 + $0x170] sm:$0xff]   ;;  %v283_v49 = vsub.s32 2, %v1238_v33 }
  0x14   :  { %952 = vmatpush3.bf16.msra.mxu0 %v1053_v19  ;;  %v124_v59 = vpack.c.bf16 %v76_v53, %v76_v53  ;;  %v1092_v11 = vld [vmem:[%s1405_s2 + $0x1a0] sm:$0xff]   ;;  %v1094_v13 = vld [vmem:[%s1405_s2 + $0x1e8] sm:$0xff]   ;;  %v1098_v17 = vld [vmem:[%s1405_s2 + $0x1f0] sm:$0xff]   ;;  %v294_v53 = vsub.s32 3, %v1238_v33 }
  0x15   :  { %974 = vmatpush3.bf16.msra.mxu1 %v1054_v20  ;;  %953 = vmatprep.subr.bf16.mxu0 %v1055_v21  ;;  %v1095_v14 = vld [vmem:[%s1405_s2 + $0x128] sm:$0xff]   ;;  %v1099_v18 = vld [vmem:[%s1405_s2 + $0x130] sm:$0xff]   ;;  %v1101_v20 = vld [vmem:[%s1405_s2 + $0x178] sm:$0xff]  }
  0x16   :  { %975 = vmatprep.subr.bf16.mxu1 %v1056_v22  ;;  %713 = vmatprep.mubr.bf16.mxu0 %v123_v55  ;;  %v1096_v15 = vld [vmem:[%s1405_s2 + $0x1a8] sm:$0xff]   ;;  %v1100_v19 = vld [vmem:[%s1405_s2 + $0x1b0] sm:$0xff]   ;;  %v1102_v21 = vld [vmem:[%s1405_s2 + $0x1f8] sm:$0xff]  }
  0x17   :  { %753 = vmatprep.mubr.bf16.mxu1 %v125_v58  ;;  %v1103_v22 = vld [vmem:[%s1405_s2 + $0x138] sm:$0xff]  }
  0x18   :  { %954 = vmatpush3.bf16.msra.mxu0 %v1057_v23  ;;  %v1104_v23 = vld [vmem:[%s1405_s2 + $0x1b8] sm:$0xff]  }
  0x19   :  { %976 = vmatpush3.bf16.msra.mxu1 %v1058_v24  ;;  %955 = vmatprep.subr.bf16.mxu0 %v1059_v28  ;;  %v1105_v24 = vld [vmem:[%s1406_s0 + $0x8] ss:$16 sps:$4 sm:$0xff]   ;;  %v1109_v26 = vld [vmem:[%s1406_s0 + $0xc] ss:$16 sps:$4 sm:$0xff]   ;;  %v259_v28 = vld [vmem:[%s1407_s1] sm:$0xff] }
  0x1a   :  { %977 = vmatprep.subr.bf16.mxu1 %v1060_v29  ;;  %v1107_v25 = vld [vmem:[%s1406_s0 + $0x28] ss:$16 sps:$4 sm:$0xff]   ;;  %v1110_v27 = vld [vmem:[%s1406_s0 + $0x2c] ss:$16 sps:$4 sm:$0xff]   ;;  %v88_v29 = vrot.slane %v1105_v24, %v1253_v38  ;;  %vm264_vm0 = vcmp.eq.s32.totalorder %v259_v28, 1  ;;  %vm275_vm1 = vcmp.eq.s32.totalorder %v259_v28, 2 }
  0x1b   :  { %v109_v32 = vrot.slane %v1110_v27, %v1253_v38  ;;  %vm286_vm2 = vcmp.eq.s32.totalorder %v259_v28, 3  ;;  %v276_v41 = vsel %vm275_vm1, 1, %v1115_v1 }
  0x1c   :  { %956 = vmatpush3.bf16.msra.mxu0 %v1061_v30  ;;  %v102_v30 = vrot.slane %v1107_v25, %v1253_v38 }
  0x1d   :  { %978 = vmatpush3.bf16.msra.mxu1 %v1062_v31  ;;  %957 = vmatprep.subr.bf16.mxu0 %v1063_v34  ;;  %v95_v31 = vrot.slane %v1109_v26, %v1253_v38  ;;  %v265_v34 = vsel %vm264_vm0, 1, %v1115_v1  ;;  %v11_v38 = vstv %s1408_s5 }
  0x1e   :  { %979 = vmatprep.subr.bf16.mxu1 %v1064_v35  ;;  %v111_v35 = vcombine.high %v88_v29, %v102_v30  ;;  %267 = vperm.xlu0 %1033, %v265_v34   ;;  %12 = vst [vmem:[#allocation2] sm:$0x1] %v11_v38 }
  0x1f   :  { %v113_v39 = vcombine.high %v95_v31, %v109_v32  ;;  %v112_v40 = vcombine.low %v95_v31, %v109_v32 }
  0x20   :  { %958 = vmatpush3.bf16.msra.mxu0 %v1065_v36  ;;  %v110_v36 = vcombine.low %v88_v29, %v102_v30  ;;  %v127_v42 = vpack.c.bf16 %v111_v35, %v111_v35 }
  0x21   :  { %980 = vmatpush3.bf16.msra.mxu1 %v1066_v37  ;;  %987 = vmatprep.subr.bf16.mxu0 %v1073_v45  ;;  %v287_v37 = vsel %vm286_vm2, 1, %v1115_v1  ;;  %v129_v44 = vpack.c.bf16 %v113_v39, %v113_v39  ;;  %v128_v45 = vpack.c.bf16 %v112_v40, %v112_v40  ;;  %v272_v1 = vsub.s32 1, %v1238_v33 }
  0x22   :  { %1009 = vmatprep.subr.bf16.mxu1 %v1074_v48  ;;  %289 = vperm.xlu1 %1034, %v287_v37   ;;  %v126_v43 = vpack.c.bf16 %v110_v36, %v110_v36  ;;  %v258_v48 = vld [vmem:[%s1409_s3] sm:$0xf] }
  0x23   :  { %714 = vmatmul.mubr.bf16.vlgmr.msra.gmra.mrb[0].mxu0 %v122_v56  ;;  %278 = vperm.xlu0 %1033, %v276_v41   ;;  %v263_v50 = vrot.slane %v258_v48, %v262_v47 }
  0x24   :  { %754 = vmatmul.mubr.bf16.vlgmr.msra.gmra.mrb[0].mxu1 %v124_v59  ;;  %988 = vmatpush3.bf16.msra.mxu0 %v1075_v51  ;;  %v273_v51 = vrot.slane %v258_v48, %v272_v1 }
  0x25   :  { %1010 = vmatpush3.bf16.msra.mxu1 %v1076_v54  ;;  %989 = vmatprep.subr.bf16.mxu0 %v1077_v57  ;;  %v284_v54 = vrot.slane %v258_v48, %v283_v49  ;;  %v295_v57 = vrot.slane %v258_v48, %v294_v53  ;;  %v941_v25 = vld [vmem:[#allocation2] ss:$0 sm:$0xff] }
  0x26   :  { %1011 = vmatprep.subr.bf16.mxu1 %v1078_v60  ;;  %793 = vmatprep.mubr.bf16.mxu0 %v127_v42 }
  0x27   :  { %833 = vmatprep.mubr.bf16.mxu1 %v129_v44 }
  0x28   :  { %990 = vmatpush3.bf16.msra.mxu0 %v1079_v61 }
  0x29   :  { %1012 = vmatpush3.bf16.msra.mxu1 %v1080_v62  ;;  %991 = vmatprep.subr.bf16.mxu0 %v1081_v63 }
  0x2a   :  { %1013 = vmatprep.subr.bf16.mxu1 %v1082_v0 }
  0x2c   :  { %992 = vmatpush3.bf16.msra.mxu0 %v1083_v2 }
  0x2d   :  { %1014 = vmatpush3.bf16.msra.mxu1 %v1084_v3  ;;  %993 = vmatprep.subr.bf16.mxu0 %v1085_v4 }
  0x2e   :  { %1015 = vmatprep.subr.bf16.mxu1 %v1086_v5 }
  0x30   :  { %994 = vmatpush3.bf16.msra.mxu0 %v1087_v6 }
  0x31   :  { %1016 = vmatpush3.bf16.msra.mxu1 %v1088_v7  ;;  %995 = vmatprep.subr.bf16.mxu0 %v1089_v8 }
  0x32   :  { %1017 = vmatprep.subr.bf16.mxu1 %v1090_v9 }
  0x34   :  { %996 = vmatpush3.bf16.msra.mxu0 %v1091_v10 }
  0x35   :  { %1018 = vmatpush3.bf16.msra.mxu1 %v1092_v11  ;;  %997 = vmatprep.subr.bf16.mxu0 %v1093_v12 }
  0x36   :  { %1019 = vmatprep.subr.bf16.mxu1 %v1094_v13 }
  0x38   :  { %998 = vmatpush3.bf16.msra.mxu0 %v1095_v14 }
  0x39   :  { %1020 = vmatpush3.bf16.msra.mxu1 %v1096_v15  ;;  %999 = vmatprep.subr.bf16.mxu0 %v1097_v16 }
  0x3a   :  { %1021 = vmatprep.subr.bf16.mxu1 %v1098_v17 }
  0x3c   :  { %1000 = vmatpush3.bf16.msra.mxu0 %v1099_v18 }
  0x3d   :  { %1022 = vmatpush3.bf16.msra.mxu1 %v1100_v19  ;;  %1001 = vmatprep.subr.bf16.mxu0 %v1101_v20 }
  0x3e   :  { %1023 = vmatprep.subr.bf16.mxu1 %v1102_v21  ;;  %v940_v21 = vld [vmem:[%s1410_s4] ss:$0 sm:$0xff] }
  0x40   :  { %1002 = vmatpush3.bf16.msra.mxu0 %v1103_v22 }
  0x41   :  { %1024 = vmatpush3.bf16.msra.mxu1 %v1104_v23 }
  0x43   :  { %794 = vmatmul.mubr.bf16.vlgmr.msra.gmra.mrb[4].mxu0 %v126_v43 }
  0x44   :  { %834 = vmatmul.mubr.bf16.vlgmr.msra.gmra.mrb[4].mxu1 %v128_v45 }
  0x9d   :  { %v268_v46 = vpop.permute.xlu0 %267 }
  0x9e   :  { %vm269_vm3 = vcmp.eq.s32.totalorder %v268_v46, 1 }
  0x9f   :  { %v274_v55 = vsel %vm269_vm3, %v273_v51, %v263_v50 }
  0xa1   :  { %v290_v56 = vpop.permute.xlu1 %289 }
  0xa2   :  { %v279_v52 = vpop.permute.xlu0 %278  ;;  %vm291_vm5 = vcmp.eq.s32.totalorder %v290_v56, 1 }
  0xa3   :  { %vm280_vm4 = vcmp.eq.s32.totalorder %v279_v52, 1 }
  0xa4   :  { %v285_v58 = vsel %vm280_vm4, %v284_v54, %v274_v55 }
  0xa5   :  { %v296_v61 = vsel %vm291_vm5, %v295_v57, %v285_v58 }
  0xf6   :  { %v959_v59 = vpop.f32.mrb[0].mxu0 }
  0xf7   :  { %v981_v60 = vpop.f32.mrb[0].mxu1  ;;  %v960_v62 = vpop.f32.mrb[1].mxu0 }
  0xf8   :  { %v961_v63 = vadd.f32 %v960_v62, %v959_v59  ;;  %v982_v0 = vpop.f32.mrb[1].mxu1  ;;  %v962_v2 = vpop.f32.mrb[2].mxu0 }
  0xf9   :  { %v983_v3 = vadd.f32 %v982_v0, %v981_v60  ;;  %v984_v4 = vpop.f32.mrb[2].mxu1  ;;  %v963_v5 = vpop.f32.mrb[3].mxu0 }
  0xfa   :  { %v716_v6 = vadd.f32 %v961_v63, %v296_v61  ;;  %v985_v7 = vpop.f32.mrb[3].mxu1 }
  0xfc   :  { %v756_v33 = vadd.f32 %v983_v3, %v716_v6 }
 0x116   :  { %v1003_v8 = vpop.f32.mrb[4].mxu0 }
 0x117   :  { %v1025_v9 = vpop.f32.mrb[4].mxu1  ;;  %v1004_v10 = vpop.f32.mrb[5].mxu0 }
 0x118   :  { %v1005_v11 = vadd.f32 %v1004_v10, %v1003_v8  ;;  %v1026_v12 = vpop.f32.mrb[5].mxu1  ;;  %v1006_v13 = vpop.f32.mrb[6].mxu0 }
 0x119   :  { %v1027_v14 = vadd.f32 %v1026_v12, %v1025_v9  ;;  %v1028_v15 = vpop.f32.mrb[6].mxu1  ;;  %v1007_v16 = vpop.f32.mrb[7].mxu0 }
 0x11a   :  { %v796_v17 = vadd.f32 %v1005_v11, %v756_v33  ;;  %v1029_v18 = vpop.f32.mrb[7].mxu1 }
 0x11c   :  { %v836_v19 = vadd.f32 %v1027_v14, %v796_v17 }
 0x11e   :  { %v842_v20 = vmul.f32 0.2, %v836_v19  ;;  %vm841_vm6 = vcmp.gt.f32.partialorder %v836_v19, 0.0 }
 0x120   :  { %v843_v22 = vsel %vm841_vm6, %v836_v19, %v842_v20 }
 0x121   :  { %v851_v23 = vmul.f32 %v940_v21, %v843_v22 }
 0x123   :  { %v853_v24 = vsel %vm852_vm7, %v851_v23, 0.0 }
 0x124   :  { %854 = vadd.xlane.f32.xlu1 %v853_v24 }
 0x1b1   :  { %v855_v26 = vpop.xlane.xlu1 %854 }
 0x1b2   :  { %v863_v27 = vadd.f32 %v941_v25, %v855_v26 }
 0x1b4   :  { %v942_v28 = vmul.f32 -1.442695, %v863_v27 }
 0x1b6   :  { %1111 = vpow2.f32 %v942_v28 }
 0x1c0   :  { %v1112_v29 = vpop.eup %1111 }
 0x1c1   :  { %v867_v30 = vadd.f32 1.0, %v1112_v29 }
 0x1c3   :  { %1113 = vrcp.f32 %v867_v30 }
 0x1cd   :  { %v1114_v31 = vpop.eup %1113 }
 0x1ce   :  { %871 = vst.msk [vmem:[%s1411_s6] sm:$0xff] %vm870_vm8, %v1114_v31 }

</bundles_post_ra>
